<compile_context>
chip_gen: v7x
topology: tpu7x:2x2x1
jax: 0.10.0
libtpu: 0.0.40
codegen_flags: <defaults>
</compile_context>

<pallas_src>
import functools

import jax
import jax.numpy as jnp
from jax import lax
from jax.experimental import pallas as pl
from jax.experimental.pallas import tpu as pltpu

_EPS = 1e-12  # matches torch.nn.functional.normalize default eps


def _l2_normalize(x):
    # x / max(||x||_2, eps)  ==  x * rsqrt(max(sum(x*x), eps^2))
    ss = jnp.sum(x * x, axis=-1, keepdims=True)
    return x * lax.rsqrt(jnp.maximum(ss, _EPS * _EPS))


def _adv_loss_kernel(cls_ref, aux_ref, w_ref, b_ref, psum_ref):
    """One batch tile -> one (1,1) partial sum of (c_n * y_n)**2."""
    cls = cls_ref[...].astype(jnp.float32)          # (TB, class_dim)
    aux = aux_ref[...].astype(jnp.float32)          # (TB, aux_dim)

    cls_n = _l2_normalize(cls)
    aux_n = _l2_normalize(aux)

    # Folded regressor: single Linear(aux_dim -> class_dim).
    y = jnp.dot(aux_n, w_ref[...],
                preferred_element_type=jnp.float32) + b_ref[...]   # (TB, class_dim)
    y_n = _l2_normalize(y)

    prod = cls_n * y_n
    # Single fused reduction; scaling by -1/(B*class_dim) happens in the wrapper.
    psum_ref[...] = jnp.sum(prod * prod, keepdims=True)            # (1, 1)


def _round_up(x, m):
    return (x + m - 1) // m * m


@functools.partial(jax.jit, static_argnames=("tile_b",))
def adv_loss(class_feature, aux_feature, w1, b1, w2, b2, *, tile_b=512):
    """Pallas wrapper. Returns the scalar adversarial similarity loss.

    Weights are stored pre-transposed as (in, out); biases as (1, out).
    """
    B, class_dim = class_feature.shape
    aux_dim = aux_feature.shape[1]

    # Fold the two Linears once in the wrapper (amortized over the whole batch):
    #   y = (a @ W1 + b1) @ W2 + b2 = a @ (W1 @ W2) + (b1 @ W2 + b2)
    w = jnp.dot(w1, w2, preferred_element_type=jnp.float32)          # (aux_dim, class_dim)
    b = jnp.dot(b1, w2, preferred_element_type=jnp.float32) + b2     # (1, class_dim)

    # Batch tile: multiple of 8 (sublane), capped at tile_b. Padding rows are
    # zero: zero class rows normalize to zero, so padded rows contribute 0 to
    # the partial sums and the mean divides by the TRUE batch size below.
    tb = min(tile_b, _round_up(B, 8))
    b_pad = _round_up(B, tb)
    if b_pad != B:
        class_feature = jnp.pad(class_feature, ((0, b_pad - B), (0, 0)))
        aux_feature = jnp.pad(aux_feature, ((0, b_pad - B), (0, 0)))
    num_tiles = b_pad // tb

    partials = pl.pallas_call(
        _adv_loss_kernel,
        out_shape=jax.ShapeDtypeStruct((num_tiles, 1), jnp.float32),
        grid_spec=pltpu.PrefetchScalarGridSpec(
            num_scalar_prefetch=0,
            grid=(num_tiles,),
            in_specs=[
                pl.BlockSpec((tb, class_dim), lambda i: (i, 0)),      # class tile
                pl.BlockSpec((tb, aux_dim), lambda i: (i, 0)),        # aux tile
                pl.BlockSpec((aux_dim, class_dim), lambda i: (0, 0)),  # folded W
                pl.BlockSpec((1, class_dim), lambda i: (0, 0)),        # folded b
            ],
            out_specs=pl.BlockSpec((1, 1), lambda i: (i, 0)),
        ),
        compiler_params=pltpu.CompilerParams(
            # Independent per-tile partial sums -> safe to shard across the two
            # TensorCores on v7x; near-neutral (but harmless) on v5e/v6e.
            dimension_semantics=("parallel",),
        ),
    )(class_feature, aux_feature, w, b)

    # Cross-tile reduction + scale outside the kernel (tiny, fuses into XLA).
    return -jnp.sum(partials) / (B * class_dim)


def _ref_adv_loss(class_feature, aux_feature, w1, b1, w2, b2):
    """Pure-JAX reference mirroring the PyTorch module (unfused regressor)."""
    def l2n(x):
        return x / jnp.maximum(jnp.linalg.norm(x, axis=-1, keepdims=True), _EPS)
    c = l2n(class_feature)
    a = l2n(aux_feature)
    y = a @ w1 + b1
    y = y @ w2 + b2
    y = l2n(y)
    return -1.0 * jnp.mean(jnp.mean((c * y) ** 2, axis=-1))


# TODO(synk): grad_reverse only affects the backward pass (gradient negation);
# this script implements the forward loss only.

if __name__ == "__main__":
    # Small shapes consistent with the module config.
    B, CLASS_DIM, AUX_DIM, PROJ_DIM = 8, 32, 16, 24

    key = jax.random.PRNGKey(0)
    k_cls, k_aux, k_w1, k_b1, k_w2, k_b2 = jax.random.split(key, 6)

    class_feature = jax.random.normal(k_cls, (B, CLASS_DIM), dtype=jnp.float32)
    aux_feature = jax.random.normal(k_aux, (B, AUX_DIM), dtype=jnp.float32)

    # torch.nn.Linear init U(-1/sqrt(fan_in), 1/sqrt(fan_in)); weights stored
    # as (in, out) so the kernel matmul is row-major.
    bound1 = 1.0 / jnp.sqrt(AUX_DIM)
    bound2 = 1.0 / jnp.sqrt(PROJ_DIM)
    w1 = jax.random.uniform(k_w1, (AUX_DIM, PROJ_DIM), jnp.float32, -bound1, bound1)
    b1 = jax.random.uniform(k_b1, (1, PROJ_DIM), jnp.float32, -bound1, bound1)
    w2 = jax.random.uniform(k_w2, (PROJ_DIM, CLASS_DIM), jnp.float32, -bound2, bound2)
    b2 = jax.random.uniform(k_b2, (1, CLASS_DIM), jnp.float32, -bound2, bound2)

    loss = adv_loss(class_feature, aux_feature, w1, b1, w2, b2)
    jax.block_until_ready(loss)

    ref = _ref_adv_loss(class_feature, aux_feature, w1, b1, w2, b2)
    assert jnp.allclose(loss, ref, atol=1e-6, rtol=1e-5), (loss, ref)

    print("KERNEL_OK")
</pallas_src>

<mosaic_0001>
module attributes {stable_mosaic.version = 11 : i64} {
  func.func @_adv_loss_kernel(%arg0: i32, %arg1: memref<8x32xf32, #tpu.memory_space<vmem>>, %arg2: memref<8x16xf32, #tpu.memory_space<vmem>>, %arg3: memref<16x32xf32, #tpu.memory_space<vmem>>, %arg4: memref<1x32xf32, #tpu.memory_space<vmem>>, %arg5: memref<1x1xf32, #tpu.memory_space<vmem>>) attributes {dimension_semantics = [#tpu.dimension_semantics<parallel>], iteration_bounds = array<i64: 1>, scalar_prefetch = 0 : i64, scratch_operands = 0 : i64, tpu.core_type = #tpu.core_type<tc>, window_params = [{transform_indices = @transform_0, window_bounds = array<i64: 8, 32>}, {transform_indices = @transform_1, window_bounds = array<i64: 8, 16>}, {pipeline_mode = #tpu.pipeline_mode<synchronous>, transform_indices = @transform_2, window_bounds = array<i64: 16, 32>}, {pipeline_mode = #tpu.pipeline_mode<synchronous>, transform_indices = @transform_3, window_bounds = array<i64: 1, 32>}, {transform_indices = @transform_4, window_bounds = array<i64: 1, 1>}]} {
    %c0 = arith.constant 0 : index
    %c0_0 = arith.constant 0 : index
    %0 = vector.load %arg1[%c0, %c0_0] : memref<8x32xf32, #tpu.memory_space<vmem>>, vector<8x32xf32>
    %c0_1 = arith.constant 0 : index
    %c0_2 = arith.constant 0 : index
    %1 = vector.load %arg2[%c0_1, %c0_2] : memref<8x16xf32, #tpu.memory_space<vmem>>, vector<8x16xf32>
    %2 = arith.mulf %0, %0 : vector<8x32xf32>
    %cst = arith.constant dense<0.000000e+00> : vector<8xf32>
    %3 = vector.multi_reduction <add>, %2, %cst [1] : vector<8x32xf32> to vector<8xf32>
    %4 = vector.shape_cast %3 : vector<8xf32> to vector<8x1xf32>
    %cst_3 = arith.constant 1.000000e-24 : f32
    %5 = vector.broadcast %cst_3 : f32 to vector<8x1xf32>
    %6 = arith.maximumf %4, %5 : vector<8x1xf32>
    %7 = math.rsqrt %6 : vector<8x1xf32>
    %8 = vector.broadcast %7 : vector<8x1xf32> to vector<8x32xf32>
    %9 = arith.mulf %0, %8 : vector<8x32xf32>
    %10 = arith.mulf %1, %1 : vector<8x16xf32>
    %cst_4 = arith.constant dense<0.000000e+00> : vector<8xf32>
    %11 = vector.multi_reduction <add>, %10, %cst_4 [1] : vector<8x16xf32> to vector<8xf32>
    %12 = vector.shape_cast %11 : vector<8xf32> to vector<8x1xf32>
    %cst_5 = arith.constant 1.000000e-24 : f32
    %13 = vector.broadcast %cst_5 : f32 to vector<8x1xf32>
    %14 = arith.maximumf %12, %13 : vector<8x1xf32>
    %15 = math.rsqrt %14 : vector<8x1xf32>
    %16 = vector.broadcast %15 : vector<8x1xf32> to vector<8x16xf32>
    %17 = arith.mulf %1, %16 : vector<8x16xf32>
    %c0_6 = arith.constant 0 : index
    %c0_7 = arith.constant 0 : index
    %18 = vector.load %arg3[%c0_6, %c0_7] : memref<16x32xf32, #tpu.memory_space<vmem>>, vector<16x32xf32>
    %cst_8 = arith.constant dense<0.000000e+00> : vector<8x32xf32>
    %19 = tpu.matmul %17, %18, %cst_8 {dimension_numbers = #tpu.dot_dimension_numbers<[1], [0], [0], [1], [0, 0, 1, 1], [], []>} : vector<8x16xf32>, vector<16x32xf32>, vector<8x32xf32> -> vector<8x32xf32>
    %c0_9 = arith.constant 0 : index
    %c0_10 = arith.constant 0 : index
    %20 = vector.load %arg4[%c0_9, %c0_10] : memref<1x32xf32, #tpu.memory_space<vmem>>, vector<1x32xf32>
    %21 = vector.broadcast %20 : vector<1x32xf32> to vector<8x32xf32>
    %22 = arith.addf %19, %21 : vector<8x32xf32>
    %23 = arith.mulf %22, %22 : vector<8x32xf32>
    %cst_11 = arith.constant dense<0.000000e+00> : vector<8xf32>
    %24 = vector.multi_reduction <add>, %23, %cst_11 [1] : vector<8x32xf32> to vector<8xf32>
    %25 = vector.shape_cast %24 : vector<8xf32> to vector<8x1xf32>
    %cst_12 = arith.constant 1.000000e-24 : f32
    %26 = vector.broadcast %cst_12 : f32 to vector<8x1xf32>
    %27 = arith.maximumf %25, %26 : vector<8x1xf32>
    %28 = math.rsqrt %27 : vector<8x1xf32>
    %29 = vector.broadcast %28 : vector<8x1xf32> to vector<8x32xf32>
    %30 = arith.mulf %22, %29 : vector<8x32xf32>
    %31 = arith.mulf %9, %30 : vector<8x32xf32>
    %32 = arith.mulf %31, %31 : vector<8x32xf32>
    %33 = vector.shape_cast %32 : vector<8x32xf32> to vector<1x8x32xf32>
    %cst_13 = arith.constant dense<0.000000e+00> : vector<1xf32>
    %34 = vector.multi_reduction <add>, %33, %cst_13 [1, 2] : vector<1x8x32xf32> to vector<1xf32>
    %35 = vector.shape_cast %34 : vector<1xf32> to vector<1x1x1xf32>
    %36 = vector.extract %35[0, 0, 0] : f32 from vector<1x1x1xf32>
    %37 = vector.broadcast %36 : f32 to vector<1x1xf32>
    %c0_14 = arith.constant 0 : index
    %c0_15 = arith.constant 0 : index
    %38 = vector.load %arg5[%c0_14, %c0_15] : memref<1x1xf32, #tpu.memory_space<vmem>>, vector<1x1xf32>
    tpu.vector_store %arg5[%c0_14, %c0_15], %37 {strides = array<i32>} : memref<1x1xf32, #tpu.memory_space<vmem>>, vector<1x1xf32>,
    return
  }
  func.func @transform_0(%arg0: i32) -> (i32, i32) {
    %c0_i32 = arith.constant 0 : i32
    %c0_i32_0 = arith.constant 0 : i32
    return %arg0, %c0_i32 : i32, i32
  }
  func.func @transform_1(%arg0: i32) -> (i32, i32) {
    %c0_i32 = arith.constant 0 : i32
    %c0_i32_0 = arith.constant 0 : i32
    return %arg0, %c0_i32 : i32, i32
  }
  func.func @transform_2(%arg0: i32) -> (i32, i32) {
    %c0_i32 = arith.constant 0 : i32
    %c0_i32_0 = arith.constant 0 : i32
    %c0_i32_1 = arith.constant 0 : i32
    return %c0_i32, %c0_i32_0 : i32, i32
  }
  func.func @transform_3(%arg0: i32) -> (i32, i32) {
    %c0_i32 = arith.constant 0 : i32
    %c0_i32_0 = arith.constant 0 : i32
    %c0_i32_1 = arith.constant 0 : i32
    return %c0_i32, %c0_i32_0 : i32, i32
  }
  func.func @transform_4(%arg0: i32) -> (i32, i32) {
    %c0_i32 = arith.constant 0 : i32
    %c0_i32_0 = arith.constant 0 : i32
    return %arg0, %c0_i32 : i32, i32
  }
}

</mosaic_0001>

<bundles_post_ra>
// kernel: adv_loss.1
= control target key start
LH: loop header
LB: loop body
LE: loop exit
PB: predicated region body
PF: predicated region fallthrough
CT: control target
= control target key end

     0   :  { %vm29_vm0 = vcmask 130048   ;;  %s266_s0 = inlined_call_operand.vmem [shape: f32[8,32], index: 0, kind: input, shape index: {}]   ;;  %s267_s1 = inlined_call_operand.vmem [shape: f32[8,16], index: 1, kind: input, shape index: {}]   ;;  %s268_s2 = inlined_call_operand.vmem [shape: f32[16,32], index: 2, kind: input, shape index: {}]   ;;  %s269_s3 = inlined_call_operand.vmem [shape: f32[1,32], index: 3, kind: input, shape index: {}]   ;;  %s270_s4 = inlined_call_operand.hbm [shape: f32[1,1], index: 4, kind: output, shape index: {}]  }
   0x1   :  { %v19_v0 = vld [vmem:[%s267_s1] sm:$0xff] }
   0x2   :  { %9 = vsyncpa [#allocation3], 0  ;;  %v28_v1 = vmul.f32 %v19_v0, %v19_v0  ;;  %v36_v3 = vld [vmem:[%s268_s2] sm:$0xff]  ;;  %v37_v4 = vld [vmem:[%s268_s2 + $0x8] sm:$0xff]  ;;  %v205_v5 = vmov 0.0|0.0   ;;  %vm206_vm1 = vmmov 0  }
   0x3   :  { %166 = vmatprep.subr.bf16.mxu0 %v205_v5  ;;  %v167_v6 = vpack.c.bf16 %v37_v4, %v36_v3  ;;  %v207_v7 = vmov 0.0   ;;  %vm21_vm2 = vcmask 261120   ;;  %v18_v12 = vld [vmem:[%s266_s0] sm:$0xff]  ;;  %s208_s0 = smov [#allocation2]   ;;  %vm138_vm3 = vcmask 0  }
   0x4   :  { %v30_v2 = vsel %vm29_vm0, %v28_v1, 0.0  ;;  %163 = vmatprep.mubr.msk.f32.mxu0 %vm206_vm1, %v207_v7  ;;  %v20_v13 = vmul.f32 %v18_v12, %v18_v12  ;;  %v154_v15 = vld [vmem:[%s269_s3] ss:$0 sm:$0xff]  ;;  %s146_s3 = sshll.u32 %s208_s0, 4  ;;  %s147_s3 = int_to_ptr.vmem [resolvable:$true] %s146_s3 }
   0x5   :  { %31 = vadd.xlane.f32.xlu0 %v30_v2  ;;  %168 = vmatpush3.bf16.msra.mxu0 %v167_v6  ;;  %s181_s24 = scalar_lea.vmem %s147_s3, 16  ;;  %s185_s25 = scalar_lea.vmem %s147_s3, 32 }
   0x6   :  { %v22_v14 = vsel %vm21_vm2, %v20_v13, 0.0  ;;  %p182_p0 = scmp.ne.s32.totalorder %s147_s3, %s181_s24  ;;  %p186_p1 = scmp.lt.s32.totalorder %s147_s3, %s147_s3 }
   0x7   :  { %p187_p2 = scmp.lt.s32.totalorder %s185_s25, %s181_s24 }
   0x9   :  { %23 = vadd.xlane.f32.xlu0 %v22_v14  ;;  %p188_p3 = por %p187_p2, %p186_p1 }
   0xb   :  { %p189_p4 = pnand %p188_p3, %p182_p0 }
  0x92   :  { %v32_v8 = vpop.xlane.xlu0 %31 }
  0x93   :  { %v33_v9 = vmax.f32 %v32_v8, 1e-24 }
  0x95   :  { %175 = vrsqrt.f32 %v33_v9 }
  0x96   :  { %v24_v21 = vpop.xlane.xlu0 %23 }
  0x97   :  { %v25_v22 = vmax.f32 %v24_v21, 1e-24 }
  0x99   :  { %177 = vrsqrt.f32 %v25_v22 }
  0x9f   :  { %v176_v10 = vpop.eup %175 }
  0xa0   :  { %v35_v11 = vmul.f32 %v176_v10, %v19_v0 }
  0xa2   :  { %164 = vmatmul.mubr.msk.f32.vlgmr.msra.gmra.mrb[0].mxu0 %vm29_vm0, %v35_v11 }
  0xa3   :  { %v178_v25 = vpop.eup %177 }
  0xa4   :  { %v27_v26 = vmul.f32 %v178_v25, %v18_v12 }
 0x175   :  { %v114_v16 = vpop.f32.mrb[0].mxu0 }
 0x176   :  { %v115_v17 = vadd.f32 %v154_v15, %v114_v16  ;;  %v165_v18 = vpop.f32.mrb[1].mxu0 }
 0x178   :  { %v118_v19 = vmul.f32 %v115_v17, %v115_v17 }
 0x17a   :  { %v119_v20 = vsel %vm21_vm2, %v118_v19, 0.0 }
 0x17b   :  { %120 = vadd.xlane.f32.xlu1 %v119_v20 }
 0x208   :  { %v121_v23 = vpop.xlane.xlu1 %120 }
 0x209   :  { %v122_v24 = vmax.f32 %v121_v23, 1e-24 }
 0x20b   :  { %179 = vrsqrt.f32 %v122_v24 }
 0x215   :  { %v180_v27 = vpop.eup %179 }
 0x216   :  { %v124_v28 = vmul.f32 %v180_v27, %v115_v17 }
 0x218   :  { %v125_v29 = vmul.f32 %v124_v28, %v27_v26 }
 0x21a   :  { %v126_v30 = vmul.f32 %v125_v29, %v125_v29 }
 0x21c   :  { %v127_v31 = vsel %vm21_vm2, %v126_v30, 0.0 }
 0x21d   :  { %128 = vadd.xlane.f32.xlu1 %v127_v31 }
 0x2aa   :  { %v129_v32 = vpop.xlane.xlu1 %128 }
 0x2ab   :  { %v130_v33 = vrot.slane %v129_v32, 4 }
 0x2ad   :  { %v131_v34 = vadd.f32 %v130_v33, %v129_v32 }
 0x2af   :  { %v132_v35 = vrot.slane %v131_v34, 2 }
 0x2b1   :  { %v133_v36 = vadd.f32 %v132_v35, %v131_v34 }
 0x2b3   :  { %v134_v37 = vrot.slane %v133_v36, 1 }
 0x2b5   :  { %v135_v38 = vadd.f32 %v134_v37, %v133_v36 }
 0x2b7   :  { %169 = vpush %v135_v38 }
 0x2e8   :  { %s170_s23 = spop %169 }
 0x2e9   :  { %v137_v39 = vstv %s170_s23 }
 0x2ea   :  { %139 = vst.msk [vmem:[#allocation2] sm:$0x1] %vm138_vm3, %v137_v39 }
 0x2eb   :  { %192 = shalt.err (!%p189_p4)
}
 0x2ec   :  { %s193_s28 = scalar_lea.hbm %s270_s4, 16 }
 0x2ed   :  { %p194_p5 = scmp.ne.s32.totalorder %s270_s4, %s193_s28  ;;  %p197_p6 = scmp.lt.u32.totalorder %s193_s28, %s270_s4 }
 0x2ef   :  { %p199_p7 = pnand %p197_p6, %p194_p5 }
 0x2f1   :  { %202 = shalt.err (!%p199_p7)
}
 0x2f2   :  { %149 = dma.vmem_to_hbm [thread:$0]  %s147_s3, 16, %s270_s4, [#allocation3]  }
 0x2f3   :  { %203 = dma.done.wait [#allocation3], 16  }
 0x2f4   :  { %204 = vsyncadd [#allocation3], 4294967280 }
 0x2f5   :  { %153 = vsyncpa [#allocation3], 1 }

</bundles_post_ra>
